<compile_context>
chip_gen: v6e
topology: v6e:2x2x1
jax: 0.10.0
libtpu: 0.0.40
codegen_flags: <defaults>
</compile_context>

<pallas_src>
import functools
import math

import jax
import jax.numpy as jnp
from jax.experimental import pallas as pl
from jax.experimental.pallas import tpu as pltpu

_LANES = 128
_MAX_PACK_GROUP = 16  # bound on static unroll / concat width in the packed kernel


# ----------------------------- kernels ---------------------------------------

def _plain_kernel(x_ref, w_ref, o_ref):
    # x_ref: (T, 1), w_ref: (1, E), o_ref: (T, E)
    o_ref[...] = (x_ref[...] * w_ref[...]).astype(o_ref.dtype)


def _plain_bias_kernel(x_ref, w_ref, b_ref, o_ref):
    o_ref[...] = (x_ref[...] * w_ref[...] + b_ref[...]).astype(o_ref.dtype)


def _packed_kernel(x_ref, w_ref, o_ref, *, embed_dim, group):
    # x_ref: (T, group), w_ref: (1, E), o_ref: (T, group*E).
    # Build the full packed row once and issue ONE full-width store per tile
    # (unmasked vst; no per-chunk masked sub-lane stores).
    del embed_dim
    x = x_ref[...]
    w = w_ref[...]
    parts = [x[:, k:k + 1] * w for k in range(group)]
    o_ref[...] = jnp.concatenate(parts, axis=-1).astype(o_ref.dtype)


def _packed_bias_kernel(x_ref, w_ref, b_ref, o_ref, *, embed_dim, group):
    del embed_dim
    x = x_ref[...]
    w = w_ref[...]
    b = b_ref[...]
    parts = [x[:, k:k + 1] * w + b for k in range(group)]
    o_ref[...] = jnp.concatenate(parts, axis=-1).astype(o_ref.dtype)


# ----------------------------- sizing helpers ---------------------------------

def _hw_params():
    """Returns (target_out_block_bytes, pipeline_budget_bytes, vmem_limit_bytes).

    Budget covers double-buffered (input + output) blocks; the explicit VMEM
    limit keeps v5e (16 MiB default scoped limit) from rejecting large blocks
    and stays within v7x's 64 MiB physical VMEM.
    """
    kind = ""
    try:
        kind = jax.devices()[0].device_kind.lower()
    except Exception:  # pragma: no cover - defensive
        pass
    if "7" in kind:
        # v7x: 64 MiB physical / 32 MiB default scoped limit per TC.
        return (10 << 20, 24 << 20, 32 << 20)
    if "v5" in kind or "v6" in kind:
        # v5e / v6e: 128 MiB physical; raise scoped limit above v5e's 16 MiB default.
        return (8 << 20, 40 << 20, 48 << 20)
    # Unknown generation: conservative settings that fit every chip.
    return (8 << 20, 24 << 20, 32 << 20)


def _pick_tile_rows(total_rows, in_row_bytes, out_row_bytes,
                    target_out_bytes, budget_bytes):
    """Rows per block: ~target output bytes, clamped so the double-buffered
    (input + output) footprint stays within `budget_bytes`; multiple of 8, or
    the full row count when that is smaller (full-dim blocks are always legal)."""
    t = max(8, target_out_bytes // max(1, out_row_bytes))
    per_row = 2 * (in_row_bytes + out_row_bytes)  # double-buffered in + out
    t = min(t, max(8, budget_bytes // max(1, per_row)))
    t = max(8, (t // 8) * 8)
    if t >= total_rows:
        return int(total_rows)
    return int(t)


# ----------------------------- wrapper ----------------------------------------

def linear_embedder(x, weight, bias=None, out_dtype=None):
    """Pallas equivalent of LinearEmbedder.forward.

    x:      (..., 1)
    weight: (embed_dim, 1)   -- PyTorch nn.Linear weight layout
    bias:   (embed_dim,) or None
    Returns (..., embed_dim).  `out_dtype` (e.g. bf16) halves writeback bytes;
    arithmetic stays in the input precision, cast happens at the store.
    """
    assert x.shape[-1] == 1, "LinearEmbedder expects last dim == 1"
    embed_dim = int(weight.shape[0])
    lead_shape = x.shape[:-1]
    n = 1
    for d in lead_shape:
        n *= int(d)
    if out_dtype is None:
        out_dtype = x.dtype
    out_bytes = jnp.dtype(out_dtype).itemsize
    x_bytes = jnp.dtype(x.dtype).itemsize

    x_flat = x.reshape(n, 1)
    w_row = weight.reshape(1, embed_dim)
    b_row = None if bias is None else bias.reshape(1, embed_dim)

    target_blk, budget, vmem_limit = _hw_params()
    compiler_params = pltpu.CompilerParams(
        dimension_semantics=("parallel",),
        vmem_limit_bytes=int(vmem_limit),
    )
    # TODO(synk): on v7x, profile per-core activity to confirm the single
    # "parallel" grid axis shards across both TensorCores; if not, add an
    # explicit CORE_PARALLEL leading core axis.

    # Constant index_map: the (1, E) weight (and bias) stay VMEM-resident.
    w_spec = pl.BlockSpec((1, embed_dim), lambda i: (0, 0))

    flops = (2 if bias is not None else 1) * n * embed_dim
    bytes_accessed = (n * x_bytes
                      + embed_dim * w_row.dtype.itemsize
                      + (embed_dim * b_row.dtype.itemsize if b_row is not None else 0)
                      + n * embed_dim * out_bytes)
    cost = pl.CostEstimate(flops=int(flops), transcendentals=0,
                           bytes_accessed=int(bytes_accessed))

    # Lane-dense packing: pack `group` logical rows so the stored row width is
    # lcm(embed_dim, 128) lanes (handles E = 32, 48, 96, 192, ...).
    group = math.lcm(embed_dim, _LANES) // embed_dim
    width = group * embed_dim
    use_packed = (embed_dim % _LANES != 0) and (2 <= group <= _MAX_PACK_GROUP)

    if use_packed:
        n_pad = -(-n // group) * group
        if n_pad != n:
            # Padding x is a tiny copy (N x 1 elements); the post-kernel [:n]
            # trim below is the costlier one (full output copy).  Callers with
            # row counts that are multiples of `group` (common) take the
            # fully copy-free path; accepting padded output upstream would
            # avoid it entirely.
            x_flat = jnp.pad(x_flat, ((0, n_pad - n), (0, 0)))
        rows = n_pad // group
        x_in = x_flat.reshape(rows, group)

        # VMEM footprints: the (tile, group) x block is lane-padded to 128
        # lanes; the (tile, width) output block is lane-dense.
        in_row_bytes = _LANES * x_bytes
        out_row_bytes = width * out_bytes
        tile = _pick_tile_rows(rows, in_row_bytes, out_row_bytes, target_blk, budget)

        kernel = functools.partial(
            _packed_kernel if bias is None else _packed_bias_kernel,
            embed_dim=embed_dim, group=group)
        in_specs = [pl.BlockSpec((tile, group), lambda i: (i, 0)), w_spec]
        args = [x_in, w_row]
        if b_row is not None:
            in_specs.append(pl.BlockSpec((1, embed_dim), lambda i: (0, 0)))
            args.append(b_row)

        out_packed = pl.pallas_call(
            kernel,
            out_shape=jax.ShapeDtypeStruct((rows, width), out_dtype),
            grid=(pl.cdiv(rows, tile),),
            in_specs=in_specs,
            out_specs=pl.BlockSpec((tile, width), lambda i: (i, 0)),
            compiler_params=compiler_params,
            cost_estimate=cost,
        )(*args)
        # Free row-major reinterpretation back to (n_pad, E); trim padding only
        # when the row count was ragged.
        out_flat = out_packed.reshape(n_pad, embed_dim)
        if n_pad != n:
            out_flat = out_flat[:n]
    else:
        in_row_bytes = _LANES * x_bytes  # (tile, 1) block is lane-padded to 128
        out_row_bytes = (-(-embed_dim // _LANES)) * _LANES * out_bytes
        tile = _pick_tile_rows(n, in_row_bytes, out_row_bytes, target_blk, budget)

        kernel = _plain_kernel if bias is None else _plain_bias_kernel
        in_specs = [pl.BlockSpec((tile, 1), lambda i: (i, 0)), w_spec]
        args = [x_flat, w_row]
        if b_row is not None:
            in_specs.append(pl.BlockSpec((1, embed_dim), lambda i: (0, 0)))
            args.append(b_row)

        out_flat = pl.pallas_call(
            kernel,
            out_shape=jax.ShapeDtypeStruct((n, embed_dim), out_dtype),
            grid=(pl.cdiv(n, tile),),
            in_specs=in_specs,
            out_specs=pl.BlockSpec((tile, embed_dim), lambda i: (i, 0)),
            compiler_params=compiler_params,
            cost_estimate=cost,
        )(*args)

    return out_flat.reshape(*lead_shape, embed_dim)


# ----------------------------- demo / check -----------------------------------

if __name__ == "__main__":
    key = jax.random.PRNGKey(0)
    k_x, k_w, k_b = jax.random.split(key, 3)

    batch, seq = 2, 8
    x = jax.random.normal(k_x, (batch, seq, 1), dtype=jnp.float32)

    # Case 1: embed_dim = 32 -> packed lane-dense path (group = 4, copy-free
    # since n % group == 0).  bias=False matches the module default.
    e1 = 32
    w1 = (jax.random.uniform(k_w, (e1, 1), dtype=jnp.float32) - 0.5) * 2.0
    out1 = jax.block_until_ready(linear_embedder(x, w1))
    ref1 = jnp.einsum("bsk,ek->bse", x, w1)
    assert out1.shape == (batch, seq, e1)
    assert jnp.allclose(out1, ref1, atol=1e-6), "packed path mismatch"

    # Case 2: embed_dim = 256 (multiple of 128) -> plain tiled path, fused bias.
    e2 = 256
    w2 = (jax.random.uniform(k_w, (e2, 1), dtype=jnp.float32) - 0.5) * 2.0
    b2 = jax.random.normal(k_b, (e2,), dtype=jnp.float32)
    out2 = jax.block_until_ready(linear_embedder(x, w2, bias=b2))
    ref2 = jnp.einsum("bsk,ek->bse", x, w2) + b2
    assert out2.shape == (batch, seq, e2)
    assert jnp.allclose(out2, ref2, atol=1e-6), "plain path mismatch"

    # Case 3: embed_dim = 48 -> generalized lcm packing (group = 8, width = 384).
    e3 = 48
    w3 = (jax.random.uniform(k_w, (e3, 1), dtype=jnp.float32) - 0.5) * 2.0
    out3 = jax.block_until_ready(linear_embedder(x, w3))
    ref3 = jnp.einsum("bsk,ek->bse", x, w3)
    assert out3.shape == (batch, seq, e3)
    assert jnp.allclose(out3, ref3, atol=1e-6), "lcm-packed path mismatch"

    # Case 4: ragged row count (n % group != 0) -> pad + trim path.
    x4 = jax.random.normal(k_x, (batch, 7, 1), dtype=jnp.float32)
    out4 = jax.block_until_ready(linear_embedder(x4, w1))
    ref4 = jnp.einsum("bsk,ek->bse", x4, w1)
    assert out4.shape == (batch, 7, e1)
    assert jnp.allclose(out4, ref4, atol=1e-6), "ragged packed path mismatch"

    # Case 5: bf16 output (f32 math, cast at the store) -> half the writeback bytes.
    out5 = jax.block_until_ready(linear_embedder(x, w1, out_dtype=jnp.bfloat16))
    assert out5.dtype == jnp.bfloat16
    assert jnp.allclose(out5.astype(jnp.float32), ref1, atol=1e-2), "bf16 out mismatch"

    print("KERNEL_OK")
</pallas_src>

<mosaic_0001>
module attributes {stable_mosaic.version = 11 : i64} {
  func.func @_packed_kernel(%arg0: i32, %arg1: memref<4x4xf32, #tpu.memory_space<vmem>>, %arg2: memref<1x32xf32, #tpu.memory_space<vmem>>, %arg3: memref<4x128xf32, #tpu.memory_space<vmem>>) attributes {dimension_semantics = [#tpu.dimension_semantics<parallel>], iteration_bounds = array<i64: 1>, scalar_prefetch = 0 : i64, scratch_operands = 0 : i64, tpu.core_type = #tpu.core_type<tc>, window_params = [{transform_indices = @transform_0, window_bounds = array<i64: 4, 4>}, {pipeline_mode = #tpu.pipeline_mode<synchronous>, transform_indices = @transform_1, window_bounds = array<i64: 1, 32>}, {transform_indices = @transform_2, window_bounds = array<i64: 4, 128>}]} {
    %c0 = arith.constant 0 : index
    %c0_0 = arith.constant 0 : index
    %0 = vector.load %arg1[%c0, %c0_0] : memref<4x4xf32, #tpu.memory_space<vmem>>, vector<4x4xf32>
    %c0_1 = arith.constant 0 : index
    %c0_2 = arith.constant 0 : index
    %1 = vector.load %arg2[%c0_1, %c0_2] : memref<1x32xf32, #tpu.memory_space<vmem>>, vector<1x32xf32>
    %2 = vector.extract_strided_slice %0 {offsets = [0, 0], sizes = [4, 1], strides = [1, 1]} : vector<4x4xf32> to vector<4x1xf32>
    %3 = vector.broadcast %2 : vector<4x1xf32> to vector<4x32xf32>
    %4 = vector.broadcast %1 : vector<1x32xf32> to vector<4x32xf32>
    %5 = arith.mulf %3, %4 : vector<4x32xf32>
    %6 = vector.extract_strided_slice %0 {offsets = [0, 1], sizes = [4, 1], strides = [1, 1]} : vector<4x4xf32> to vector<4x1xf32>
    %7 = vector.broadcast %6 : vector<4x1xf32> to vector<4x32xf32>
    %8 = vector.broadcast %1 : vector<1x32xf32> to vector<4x32xf32>
    %9 = arith.mulf %7, %8 : vector<4x32xf32>
    %10 = vector.extract_strided_slice %0 {offsets = [0, 2], sizes = [4, 1], strides = [1, 1]} : vector<4x4xf32> to vector<4x1xf32>
    %11 = vector.broadcast %10 : vector<4x1xf32> to vector<4x32xf32>
    %12 = vector.broadcast %1 : vector<1x32xf32> to vector<4x32xf32>
    %13 = arith.mulf %11, %12 : vector<4x32xf32>
    %14 = vector.extract_strided_slice %0 {offsets = [0, 3], sizes = [4, 1], strides = [1, 1]} : vector<4x4xf32> to vector<4x1xf32>
    %15 = vector.broadcast %14 : vector<4x1xf32> to vector<4x32xf32>
    %16 = vector.broadcast %1 : vector<1x32xf32> to vector<4x32xf32>
    %17 = arith.mulf %15, %16 : vector<4x32xf32>
    %18 = tpu.concatenate %5, %9, %13, %17 in 1 : vector<4x32xf32>, vector<4x32xf32>, vector<4x32xf32>, vector<4x32xf32> -> vector<4x128xf32>
    %c0_3 = arith.constant 0 : index
    %c0_4 = arith.constant 0 : index
    %19 = vector.load %arg3[%c0_3, %c0_4] : memref<4x128xf32, #tpu.memory_space<vmem>>, vector<4x128xf32>
    tpu.vector_store %arg3[%c0_3, %c0_4], %18 {strides = array<i32>} : memref<4x128xf32, #tpu.memory_space<vmem>>, vector<4x128xf32>,
    return
  }
  func.func @transform_0(%arg0: i32) -> (i32, i32) {
    %c0_i32 = arith.constant 0 : i32
    %c0_i32_0 = arith.constant 0 : i32
    return %arg0, %c0_i32 : i32, i32
  }
  func.func @transform_1(%arg0: i32) -> (i32, i32) {
    %c0_i32 = arith.constant 0 : i32
    %c0_i32_0 = arith.constant 0 : i32
    %c0_i32_1 = arith.constant 0 : i32
    return %c0_i32, %c0_i32_0 : i32, i32
  }
  func.func @transform_2(%arg0: i32) -> (i32, i32) {
    %c0_i32 = arith.constant 0 : i32
    %c0_i32_0 = arith.constant 0 : i32
    return %arg0, %c0_i32 : i32, i32
  }
}

</mosaic_0001>

<bundles_post_ra>
// kernel: tpu_custom_call.1
= control target key start
LH: loop header
LB: loop body
LE: loop exit
PB: predicated region body
PF: predicated region fallthrough
CT: control target
= control target key end

     0   :  { %7 = vsyncpa [#allocation3], 0  ;;  %s179_s0 = inlined_call_operand.hbm [shape: f32[4,4], index: 0, kind: input, shape index: {}]   ;;  %s180_s1 = inlined_call_operand.vmem [shape: f32[1,32], index: 1, kind: input, shape index: {}]   ;;  %s181_s2 = inlined_call_operand.hbm [shape: f32[4,128], index: 2, kind: output, shape index: {}]  }
   0x1   :  { %8 = vsyncpa [#allocation4], 0  ;;  %s146_s9 = smov [#allocation2]  }
   0x2   :  { %s15_s10 = sshll.u32 %s146_s9, 4  ;;  %s16_s10 = int_to_ptr.vmem [resolvable:$true] %s15_s10 }
   0x3   :  { %s110_s11 = scalar_lea.vmem %s16_s10, 64  ;;  %p115_p1 = scmp.lt.s32.totalorder %s16_s10, %s16_s10 }
   0x4   :  { %p111_p0 = scmp.ne.s32.totalorder %s16_s10, %s110_s11  ;;  %p116_p2 = scmp.lt.s32.totalorder %s110_s11, %s110_s11 }
   0x6   :  { %p117_p3 = por %p116_p2, %p115_p1 }
   0x8   :  { %p118_p4 = pnand %p117_p3, %p111_p0 }
   0xa   :  { %121 = shalt.err (!%p118_p4)
}
   0xb   :  { %18 = dma.hbm_to_vmem [thread:$0]  %s179_s0, 64, %s16_s10, [#allocation3]  }
   0xc   :  { %142 = dma.done.wait [#allocation3], 64  }
   0xd   :  { %143 = vsyncadd [#allocation3], 4294967232  ;;  %v147_v0 = vmov 1   ;;  %v148_v1 = vmov 3   ;;  %v24_v2 = vld [vmem:[#allocation2] sm:$0xf] }
   0xe   :  { %97 = vset.pattern.permute.xlu0 %v147_v0  ;;  %99 = vset.pattern.permute.xlu1 %v148_v1  ;;  %v149_v3 = vmov 2   ;;  %v150_v4 = vmov 0   ;;  %v87_v5 = vld [vmem:[%s180_s1] ss:$0 sm:$0xff]  ;;  %s151_s0 = smov 32   ;;  %s152_s16 = smov 96  }
   0xf   :  { %39 = vperm.xlu0 %97, %v24_v2   ;;  %49 = vperm.xlu1 %99, %v24_v2   ;;  %s153_s17 = smov 64   ;;  %vm65_vm0 = vcmask 261120   ;;  %vm67_vm1 = vcmask 523264   ;;  %s154_s18 = smov [#allocation5]   ;;  %vm69_vm2 = vcmask 785408  }
  0x10   :  { %s78_s19 = sshll.u32 %s154_s18, 4  ;;  %s79_s19 = int_to_ptr.vmem [resolvable:$true] %s78_s19 }
  0x11   :  { %s122_s1 = scalar_lea.vmem %s79_s19, 64  ;;  %p127_p6 = scmp.lt.s32.totalorder %s79_s19, %s79_s19 }
  0x12   :  { %p123_p5 = scmp.ne.s32.totalorder %s79_s19, %s122_s1  ;;  %p128_p7 = scmp.lt.s32.totalorder %s122_s1, %s122_s1 }
  0x13   :  { %98 = vset.pattern.permute.xlu0 %v149_v3  ;;  %100 = vset.pattern.permute.xlu1 %v150_v4 }
  0x14   :  { %44 = vperm.xlu0 %98, %v24_v2   ;;  %28 = vperm.xlu1 %100, %v24_v2   ;;  %p129_p8 = por %p128_p7, %p127_p6 }
  0x16   :  { %p130_p9 = pnand %p129_p8, %p123_p5 }
  0x18   :  { %101 = vset.pattern.permute.xlu0 %v148_v1 }
  0x8a   :  { %v40_v6 = vpop.permute.xlu0 %39  ;;  %v50_v7 = vpop.permute.xlu1 %49 }
  0x8b   :  { %v42_v8 = vmul.f32 %v87_v5, %v40_v6  ;;  %v52_v9 = vmul.f32 %v87_v5, %v50_v7 }
  0x8d   :  { %54 = vrot.lane.b32.xlu1 %v42_v8, %s151_s0 }
  0x8f   :  { %v45_v10 = vpop.permute.xlu0 %44  ;;  %v29_v12 = vpop.permute.xlu1 %28 }
  0x90   :  { %v47_v11 = vmul.f32 %v87_v5, %v45_v10  ;;  %v37_v14 = vmul.f32 %v87_v5, %v29_v12 }
  0x91   :  { %62 = vrot.lane.b32.xlu1 %v52_v9, %s152_s16 }
  0x92   :  { %58 = vrot.lane.b32.xlu0 %v47_v11, %s153_s17 }
  0xff   :  { %v55_v13 = vpop.permute.xlu1 %54 }
 0x100   :  { %v66_v16 = vsel %vm65_vm0, %v37_v14, %v55_v13 }
 0x103   :  { %v63_v15 = vpop.permute.xlu1 %62 }
 0x104   :  { %v59_v17 = vpop.permute.xlu0 %58 }
 0x105   :  { %v68_v18 = vsel %vm67_vm1, %v66_v16, %v59_v17 }
 0x106   :  { %v70_v19 = vsel %vm69_vm2, %v68_v18, %v63_v15 }
 0x107   :  { %71 = vst [vmem:[#allocation5] sm:$0xf] %v70_v19 }
 0x108   :  { %133 = shalt.err (!%p130_p9)
}
 0x109   :  { %81 = dma.vmem_to_hbm [thread:$0]  %s79_s19, 64, %s181_s2, [#allocation4]  }
 0x10a   :  { %144 = dma.done.wait [#allocation4], 64  }
 0x10b   :  { %145 = vsyncadd [#allocation4], 4294967232 }
 0x10c   :  { %85 = vsyncpa [#allocation3], 1 }
 0x10d   :  { %86 = vsyncpa [#allocation4], 1 }

</bundles_post_ra>
